<compile_context>
chip_gen: v7x
topology: tpu7x:2x2x1
jax: 0.10.0
libtpu: 0.0.40
codegen_flags: <defaults>
</compile_context>

<pallas_src>
import math

import jax
import jax.numpy as jnp
from jax import lax
from jax.experimental import pallas as pl
from jax.experimental.pallas import tpu as pltpu


def _cosine_linear_kernel(sigma_ref, x_ref, wn_ref, o_ref):
    # max(sqrt(s), 1e-12) == sqrt(max(s, 1e-24))
    eps2 = 1e-24

    x = x_ref[...].astype(jnp.float32)                       # (TM, D)

    # Row-wise inverse L2 norm via rsqrt (EUP), no divides.
    inv_x = lax.rsqrt(jnp.maximum(jnp.sum(x * x, axis=1, keepdims=True), eps2))  # (TM, 1)

    # Weight rows arrive pre-normalized (and possibly bf16); contract on the
    # shared last dim (no transposed operand), accumulate in f32 on the MXU.
    raw = lax.dot_general(
        x.astype(wn_ref.dtype), wn_ref[...],
        dimension_numbers=(((1,), (1,)), ((), ())),
        preferred_element_type=jnp.float32)                  # (TM, TN)

    # Fold x-normalization and sigma into a single broadcast scale.
    o_ref[...] = (raw * (sigma_ref[0, 0] * inv_x)).astype(o_ref.dtype)


def _round_up(a, b):
    return ((a + b - 1) // b) * b


def _vmem_budget_bytes():
    cap = 128 * 1024 * 1024
    try:
        cap = int(pltpu.get_tpu_info().vmem_capacity_bytes)
    except Exception:
        pass
    # Leave ~25% headroom for compiler-internal scratch and double buffers:
    # -> 48 MiB on v7x (64 MiB VMEM/TC), 96 MiB on v5e/v6e (128 MiB VMEM).
    return (cap * 3) // 4


def cosine_linear(x, weight, sigma=None, *, block_m=None, block_n=512,
                  use_bf16_matmul=True):
    """x: (B, D); weight: (O, D); sigma: scalar or None. Returns (B, O)."""
    B, D = x.shape
    O, Dw = weight.shape
    assert D == Dw, "in_features mismatch"

    out_dtype = x.dtype
    # bf16 (or narrower) output tiles need a 16-row sublane minimum.
    min_sub = 8 if jnp.dtype(out_dtype).itemsize == 4 else 16

    if block_m is None:
        block_m = 256 if B >= 256 else 128
    TM = min(block_m, _round_up(B, min_sub))

    O_pad = _round_up(O, 128)

    # Pre-normalize weight rows once in f32, pad to lane-dense O_pad, cast.
    w32 = weight.astype(jnp.float32)
    inv_w = lax.rsqrt(jnp.maximum(jnp.sum(w32 * w32, axis=1, keepdims=True), 1e-24))
    wn = w32 * inv_w
    if O_pad != O:
        wn = jnp.pad(wn, ((0, O_pad - O), (0, 0)))
    w_dtype = jnp.bfloat16 if use_bf16_matmul else jnp.float32
    wn = wn.astype(w_dtype)

    sigma_val = jnp.float32(1.0) if sigma is None else jnp.asarray(sigma, jnp.float32)
    sigma_arr = sigma_val.reshape(1, 1)

    x_isz = jnp.dtype(x.dtype).itemsize
    w_isz = jnp.dtype(w_dtype).itemsize
    o_isz = jnp.dtype(out_dtype).itemsize

    budget = _vmem_budget_bytes()
    # Working set if the full (padded, normalized) weight is kept resident
    # (count 2x everywhere to cover the pipeliner's buffer pairs).
    resident_bytes = (2 * TM * D * x_isz
                      + 2 * O_pad * D * w_isz
                      + 2 * TM * O_pad * o_isz
                      + (1 << 20))

    if resident_bytes <= budget:
        # --- Fast path: weight fully VMEM-resident, DMA'd once. ---
        grid = (pl.cdiv(B, TM),)
        in_specs = [
            pl.BlockSpec(memory_space=pltpu.SMEM),           # sigma scalar
            pl.BlockSpec((TM, D), lambda i: (i, 0)),         # x batch tile
            pl.BlockSpec((O_pad, D), lambda i: (0, 0)),      # resident weight
        ]
        out_specs = pl.BlockSpec((TM, O_pad), lambda i: (i, 0))
        dims = ("parallel",)
        vmem_limit = min(max(resident_bytes, 16 << 20), budget)
    else:
        # --- Fallback: stream tiles; re-read whichever side costs less. ---
        TN = _round_up(min(block_n, O_pad), 128)
        gm, gn = pl.cdiv(B, TM), pl.cdiv(O_pad, TN)
        reread_w = gm * O_pad * D * w_isz                    # W streamed per batch tile
        reread_x = gn * B * D * x_isz                        # x streamed per class tile
        if reread_w <= reread_x:
            grid = (gm, gn)                                  # W streams innermost
            x_map = lambda i, j: (i, 0)
            w_map = lambda i, j: (j, 0)
            o_map = lambda i, j: (i, j)
        else:
            grid = (gn, gm)                                  # x streams innermost
            x_map = lambda j, i: (i, 0)
            w_map = lambda j, i: (j, 0)
            o_map = lambda j, i: (i, j)
        in_specs = [
            pl.BlockSpec(memory_space=pltpu.SMEM),
            pl.BlockSpec((TM, D), x_map),
            pl.BlockSpec((TN, D), w_map),
        ]
        out_specs = pl.BlockSpec((TM, TN), o_map)
        dims = ("parallel", "parallel")
        tile_bytes = 2 * (TM * D * x_isz + TN * D * w_isz + TM * TN * o_isz)
        vmem_limit = min(max(4 * tile_bytes, 16 << 20), budget)

    out = pl.pallas_call(
        _cosine_linear_kernel,
        out_shape=jax.ShapeDtypeStruct((B, O_pad), out_dtype),
        grid=grid,
        in_specs=in_specs,
        out_specs=out_specs,
        compiler_params=pltpu.CompilerParams(
            dimension_semantics=dims,
            vmem_limit_bytes=int(vmem_limit)),
    )(sigma_arr, x, wn)

    return out[:, :O]


def _reference(x, w, sigma):
    eps = 1e-12

    def norm_rows(v):
        n = jnp.sqrt(jnp.sum(v * v, axis=1, keepdims=True))
        return v / jnp.maximum(n, eps)

    return sigma * (norm_rows(x) @ norm_rows(w).T)


if __name__ == "__main__":
    # Module config: in_features=32, out_features=16, sigma=True (filled with 1).
    in_features, out_features = 32, 16
    batch = 8

    key = jax.random.PRNGKey(0)
    kx, kw = jax.random.split(key, 2)

    x = jax.random.normal(kx, (batch, in_features), dtype=jnp.float32)

    # CosineLinear.reset_parameters: uniform(-stdv, stdv), stdv = 1/sqrt(in_features)
    stdv = 1.0 / math.sqrt(in_features)
    w = jax.random.uniform(kw, (out_features, in_features), jnp.float32, -stdv, stdv)
    sigma = jnp.float32(1.0)

    ref = _reference(x, w, sigma)

    # Default path: bf16 MXU operands, f32 accumulation (relaxed tolerance).
    out_bf16 = jax.block_until_ready(cosine_linear(x, w, sigma))
    assert out_bf16.shape == (batch, out_features)
    assert jnp.allclose(out_bf16, ref, atol=1e-2, rtol=1e-2), "bf16 path mismatch"

    # Full-precision path for tight numerical verification.
    out_f32 = jax.block_until_ready(cosine_linear(x, w, sigma, use_bf16_matmul=False))
    assert out_f32.shape == (batch, out_features)
    assert jnp.allclose(out_f32, ref, atol=1e-5, rtol=1e-5), "f32 path mismatch"

    print("KERNEL_OK")
</pallas_src>

<mosaic_0001>
module attributes {stable_mosaic.version = 11 : i64} {
  func.func @_cosine_linear_kernel(%arg0: i32, %arg1: memref<1x1xf32, #tpu.memory_space<smem>>, %arg2: memref<8x32xf32, #tpu.memory_space<vmem>>, %arg3: memref<128x32xbf16, #tpu.memory_space<vmem>>, %arg4: memref<8x128xf32, #tpu.memory_space<vmem>>) attributes {dimension_semantics = [#tpu.dimension_semantics<parallel>], iteration_bounds = array<i64: 1>, scalar_prefetch = 0 : i64, scratch_operands = 0 : i64, tpu.core_type = #tpu.core_type<tc>, window_params = [{transform_indices = @transform_0, window_bounds = array<i64: 1, 1>}, {transform_indices = @transform_1, window_bounds = array<i64: 8, 32>}, {pipeline_mode = #tpu.pipeline_mode<synchronous>, transform_indices = @transform_2, window_bounds = array<i64: 128, 32>}, {transform_indices = @transform_3, window_bounds = array<i64: 8, 128>}]} {
    %c0 = arith.constant 0 : index
    %c0_0 = arith.constant 0 : index
    %0 = vector.load %arg2[%c0, %c0_0] : memref<8x32xf32, #tpu.memory_space<vmem>>, vector<8x32xf32>
    %1 = arith.mulf %0, %0 : vector<8x32xf32>
    %cst = arith.constant dense<0.000000e+00> : vector<8xf32>
    %2 = vector.multi_reduction <add>, %1, %cst [1] : vector<8x32xf32> to vector<8xf32>
    %3 = vector.shape_cast %2 : vector<8xf32> to vector<8x1xf32>
    %cst_1 = arith.constant 1.000000e-24 : f32
    %4 = vector.broadcast %cst_1 : f32 to vector<8x1xf32>
    %5 = arith.maximumf %3, %4 : vector<8x1xf32>
    %6 = math.rsqrt %5 : vector<8x1xf32>
    %7 = arith.truncf %0 : vector<8x32xf32> to vector<8x32xbf16>
    %c0_2 = arith.constant 0 : index
    %c0_3 = arith.constant 0 : index
    %8 = vector.load %arg3[%c0_2, %c0_3] : memref<128x32xbf16, #tpu.memory_space<vmem>>, vector<128x32xbf16>
    %cst_4 = arith.constant dense<0.000000e+00> : vector<8x128xf32>
    %9 = tpu.matmul %7, %8, %cst_4 {dimension_numbers = #tpu.dot_dimension_numbers<[1], [1], [0], [0], [0, 0, 1, 0], [], []>} : vector<8x32xbf16>, vector<128x32xbf16>, vector<8x128xf32> -> vector<8x128xf32>
    %c0_5 = arith.constant 0 : index
    %c0_6 = arith.constant 0 : index
    %10 = memref.load %arg1[%c0_5, %c0_6] : memref<1x1xf32, #tpu.memory_space<smem>>
    %11 = vector.broadcast %10 : f32 to vector<8x1xf32>
    %12 = arith.mulf %11, %6 : vector<8x1xf32>
    %13 = vector.broadcast %12 : vector<8x1xf32> to vector<8x128xf32>
    %14 = arith.mulf %9, %13 : vector<8x128xf32>
    %c0_7 = arith.constant 0 : index
    %c0_8 = arith.constant 0 : index
    %15 = vector.load %arg4[%c0_7, %c0_8] : memref<8x128xf32, #tpu.memory_space<vmem>>, vector<8x128xf32>
    tpu.vector_store %arg4[%c0_7, %c0_8], %14 {strides = array<i32>} : memref<8x128xf32, #tpu.memory_space<vmem>>, vector<8x128xf32>,
    return
  }
  func.func @transform_0(%arg0: i32) -> (i32, i32) {
    %c0_i32 = arith.constant 0 : i32
    %c0_i32_0 = arith.constant 0 : i32
    %c0_i32_1 = arith.constant 0 : i32
    return %c0_i32, %c0_i32_0 : i32, i32
  }
  func.func @transform_1(%arg0: i32) -> (i32, i32) {
    %c0_i32 = arith.constant 0 : i32
    %c0_i32_0 = arith.constant 0 : i32
    return %arg0, %c0_i32 : i32, i32
  }
  func.func @transform_2(%arg0: i32) -> (i32, i32) {
    %c0_i32 = arith.constant 0 : i32
    %c0_i32_0 = arith.constant 0 : i32
    %c0_i32_1 = arith.constant 0 : i32
    return %c0_i32, %c0_i32_0 : i32, i32
  }
  func.func @transform_3(%arg0: i32) -> (i32, i32) {
    %c0_i32 = arith.constant 0 : i32
    %c0_i32_0 = arith.constant 0 : i32
    return %arg0, %c0_i32 : i32, i32
  }
}

</mosaic_0001>

<bundles_post_ra>
// kernel: tpu_custom_call.1
= control target key start
LH: loop header
LB: loop body
LE: loop exit
PB: predicated region body
PF: predicated region fallthrough
CT: control target
= control target key end

     0   :  { %vm19_vm0 = vcmask 261120   ;;  %v243_v0 = vmov 0.0   ;;  %vm244_vm1 = vmmov 0   ;;  %s318_s0 = inlined_call_operand.<no memory space> [shape: f32[1,1], index: 0, kind: input, shape index: {}]   ;;  %s319_s1 = inlined_call_operand.vmem [shape: f32[8,32], index: 1, kind: input, shape index: {}]   ;;  %s320_s2 = inlined_call_operand.vmem [shape: bf16[128,32], index: 2, kind: input, shape index: {}]   ;;  %s321_s3 = inlined_call_operand.hbm [shape: f32[8,128], index: 3, kind: output, shape index: {}]  }
   0x1   :  { %186 = vmatprep.subr.bf16.mxu0 %v243_v0  ;;  %v209_v1 = vld [vmem:[%s320_s2] sm:$0xff]   ;;  %202 = vmatprep.mubr.msk.bf16.mxu0 %vm244_vm1, %v243_v0  ;;  %v210_v3 = vld [vmem:[%s320_s2 + $0x8] sm:$0xff]  }
   0x2   :  { %v86_v2 = vsel %vm19_vm0, %v209_v1, 0  ;;  %v17_v4 = vld [vmem:[%s319_s1] sm:$0xff] }
   0x3   :  { %187 = vmatpush3.bf16.xpose.msra.mxu0 %v86_v2 }
   0x4   :  { %188 = vmatprep.subr.bf16.mxu0 %v243_v0 }
   0x5   :  { %9 = vsyncpa [#allocation4], 0  ;;  %v89_v5 = vsel %vm19_vm0, %v210_v3, 0  ;;  %v18_v6 = vmul.f32 %v17_v4, %v17_v4  ;;  %v211_v8 = vld [vmem:[%s320_s2 + $0x10] sm:$0xff]   ;;  %v212_v10 = vld [vmem:[%s320_s2 + $0x18] sm:$0xff]   ;;  %v25_v20 = vpack.c.bf16 %v17_v4, %v17_v4  ;;  %v150_v24 = vstv %s318_s0  ;;  %s245_s4 = smov [#allocation3]  }
   0x6   :  { %v92_v9 = vsel %vm19_vm0, %v211_v8, 0  ;;  %v95_v11 = vsel %vm19_vm0, %v212_v10, 0  ;;  %v213_v12 = vld [vmem:[%s320_s2 + $0x20] sm:$0xff]   ;;  %v214_v14 = vld [vmem:[%s320_s2 + $0x28] sm:$0xff]   ;;  %v215_v16 = vld [vmem:[%s320_s2 + $0x30] sm:$0xff]   ;;  %s160_s5 = sshll.u32 %s245_s4, 4  ;;  %s161_s5 = int_to_ptr.vmem [resolvable:$true] %s160_s5 }
   0x7   :  { %v20_v7 = vsel %vm19_vm0, %v18_v6, 0.0  ;;  %v98_v13 = vsel %vm19_vm0, %v213_v12, 0  ;;  %v101_v15 = vsel %vm19_vm0, %v214_v14, 0  ;;  %v104_v17 = vsel %vm19_vm0, %v215_v16, 0  ;;  %v216_v18 = vld [vmem:[%s320_s2 + $0x38] sm:$0xff]   ;;  %s219_s2 = scalar_lea.vmem %s161_s5, 128  ;;  %p224_p1 = scmp.lt.s32.totalorder %s161_s5, %s161_s5 }
   0x8   :  { %21 = vadd.xlane.f32.xlu0 %v20_v7  ;;  %v107_v19 = vsel %vm19_vm0, %v216_v18, 0  ;;  %p220_p0 = scmp.ne.s32.totalorder %s161_s5, %s219_s2  ;;  %p225_p2 = scmp.lt.s32.totalorder %s219_s2, %s219_s2 }
   0xa   :  { %p226_p3 = por %p225_p2, %p224_p1 }
   0xb   :  { %189 = vmatpush3.bf16.xpose.msra.mxu0 %v89_v5 }
   0xc   :  { %190 = vmatprep.subr.bf16.mxu0 %v243_v0  ;;  %p227_p4 = pnand %p226_p3, %p220_p0 }
  0x13   :  { %191 = vmatpush3.bf16.xpose.msra.mxu0 %v92_v9 }
  0x14   :  { %192 = vmatprep.subr.bf16.mxu0 %v243_v0 }
  0x1b   :  { %193 = vmatpush3.bf16.xpose.msra.mxu0 %v95_v11 }
  0x1c   :  { %194 = vmatprep.subr.bf16.mxu0 %v243_v0 }
  0x23   :  { %195 = vmatpush3.bf16.xpose.msra.mxu0 %v98_v13 }
  0x24   :  { %196 = vmatprep.subr.bf16.mxu0 %v243_v0 }
  0x2b   :  { %197 = vmatpush3.bf16.xpose.msra.mxu0 %v101_v15 }
  0x2c   :  { %198 = vmatprep.subr.bf16.mxu0 %v243_v0 }
  0x33   :  { %199 = vmatpush3.bf16.xpose.msra.mxu0 %v104_v17 }
  0x34   :  { %200 = vmatprep.subr.bf16.mxu0 %v243_v0 }
  0x3b   :  { %201 = vmatpush3.bf16.xpose.msra.mxu0 %v107_v19 }
  0x42   :  { %203 = vmatmul.mubr.msk.bf16.vlgmr.msra.gmra.mrb[0].mxu0 %vm19_vm0, %v25_v20 }
  0x95   :  { %v22_v21 = vpop.xlane.xlu0 %21 }
  0x96   :  { %v23_v22 = vmax.f32 %v22_v21, 1e-24 }
  0x98   :  { %217 = vrsqrt.f32 %v23_v22 }
  0xa2   :  { %v218_v23 = vpop.eup %217 }
  0xa3   :  { %v151_v25 = vmul.f32 %v218_v23, %v150_v24 }
 0x115   :  { %v143_v26 = vpop.f32.mrb[0].mxu0 }
 0x116   :  { %v152_v27 = vmul.f32 %v151_v25, %v143_v26  ;;  %v204_v28 = vpop.f32.mrb[1].mxu0 }
 0x117   :  { %v146_v29 = vpop.f32.mrb[2].mxu0 }
 0x118   :  { %153 = vst [vmem:[#allocation3] sm:$0xff] %v152_v27  ;;  %v205_v30 = vpop.f32.mrb[3].mxu0 }
 0x119   :  { %230 = shalt.err (!%p227_p4)
}
 0x11a   :  { %s231_s0 = scalar_lea.hbm %s321_s3, 128 }
 0x11b   :  { %p232_p5 = scmp.ne.s32.totalorder %s321_s3, %s231_s0  ;;  %p235_p6 = scmp.lt.u32.totalorder %s231_s0, %s321_s3 }
 0x11d   :  { %p237_p7 = pnand %p235_p6, %p232_p5 }
 0x11f   :  { %240 = shalt.err (!%p237_p7)
}
 0x120   :  { %163 = dma.vmem_to_hbm [thread:$0]  %s161_s5, 128, %s321_s3, [#allocation4]  }
 0x121   :  { %241 = dma.done.wait [#allocation4], 128  }
 0x122   :  { %242 = vsyncadd [#allocation4], 4294967168 }
 0x123   :  { %167 = vsyncpa [#allocation4], 1 }

</bundles_post_ra>
